<compile_context>
chip_gen: v6e
topology: v6e:2x2x1
jax: 0.10.0
libtpu: 0.0.40
codegen_flags: <defaults>
</compile_context>

<pallas_src>
import jax
import jax.numpy as jnp
from jax.experimental import pallas as pl
from jax.experimental.pallas import tpu as pltpu


def two_layer_kernel(w1_ref, w_out_t_ref, b_out_ref, x_ref, o_ref):
    """One batch element per grid step; weights are VMEM-resident.

    w1_ref      : (H, In)    = U[:, :k] @ diag(S) @ V^T[:k, :]  (pre-folded)
    w_out_t_ref : (H, O)     = output Linear weight, pre-transposed
    b_out_ref   : (1, O)     = output Linear bias
    x_ref       : (1, In, M) = current batch element (M must equal H)
    o_ref       : (1, H, O)  = current output block
    """
    # h = W1 @ x                                     (H, M)   -- MXU
    h = jnp.dot(w1_ref[...], x_ref[0], preferred_element_type=jnp.float32)
    # sigmoid                                                   -- EUP
    h = jax.nn.sigmoid(h)
    # output Linear, bias add fused into the store   (H, O)   -- MXU + VPU
    o_ref[0] = (
        jnp.dot(h, w_out_t_ref[...], preferred_element_type=jnp.float32)
        + b_out_ref[...]
    )
    # TODO(synk): for truly large-scale use, a batch-last lane-dense layout
    # (>=128 lanes through to the store) would avoid masked stores on the
    # O=8 output axis; marginal at this micro size.


def prepare_params(vt, s_param, u, w_out, b_out):
    """One-time parameter plumbing: fold U diag(S) V^T into a single weight."""
    k = s_param.shape[0]
    u_k = jnp.asarray(u[:, :k], jnp.float32)                    # (H, k)
    vt_k = jnp.asarray(vt[:k, :], jnp.float32)                  # (k, In)
    s = jnp.asarray(s_param, jnp.float32)                       # (k,)
    w1 = (u_k * s[None, :]) @ vt_k                              # (H, In)
    return {
        "w1": w1,
        "w_out_t": jnp.asarray(w_out, jnp.float32).T,           # (H, O)
        "b_out": jnp.asarray(b_out, jnp.float32).reshape(1, -1),  # (1, O)
    }


def two_layer_net(params, x):
    """Per-call path: one pallas_call, gridded over the batch axis of x."""
    w1, w_out_t, b_out = params["w1"], params["w_out_t"], params["b_out"]
    H, In = w1.shape
    O = w_out_t.shape[1]

    squeeze = x.ndim == 2
    if squeeze:
        x = x[None]                                   # (1, In, M)
    B, In_x, M = x.shape
    assert In_x == In, "x feature dim must equal input_size"
    assert M == H, "nn.Linear(hidden, out) requires x.shape[-1] == hidden_size"

    const2 = lambda b: (0, 0)                         # weights: same block every step
    out = pl.pallas_call(
        two_layer_kernel,
        out_shape=jax.ShapeDtypeStruct((B, H, O), jnp.float32),
        grid=(B,),
        in_specs=[
            pl.BlockSpec((H, In), const2),                   # W1      (resident)
            pl.BlockSpec((H, O), const2),                    # W_out^T (resident)
            pl.BlockSpec((1, O), const2),                    # bias    (resident)
            pl.BlockSpec((1, In, M), lambda b: (b, 0, 0)),   # x       (pipelined)
        ],
        out_specs=pl.BlockSpec((1, H, O), lambda b: (b, 0, 0)),
        compiler_params=pltpu.CompilerParams(
            dimension_semantics=("parallel",)),              # engages both v7x TCs
    )(w1, w_out_t, b_out, x)
    return out[0] if squeeze else out


def reference(x, vt, s_param, u, w_out, b_out):
    """Pure-JAX mirror of the PyTorch forward (explicit padded diag)."""
    In = vt.shape[0]
    H = u.shape[0]
    k = s_param.shape[0]
    h = vt @ x
    d = jnp.zeros((H, In), jnp.float32)
    d = d.at[jnp.arange(k), jnp.arange(k)].set(s_param)
    h = d @ h
    h = u @ h
    h = jax.nn.sigmoid(h)
    return h @ w_out.T + b_out


if __name__ == "__main__":
    input_size, hidden_size, output_size = 16, 32, 8
    batch = 4

    key = jax.random.PRNGKey(0)
    k_a, k_w, k_b, k_x = jax.random.split(key, 4)

    # Deterministic "buffers": SVD of a random (hidden, input) matrix,
    # mirroring torch.svd(torch.rand(hidden, input), some=False).
    a = jax.random.uniform(k_a, (hidden_size, input_size), dtype=jnp.float32)
    u_mat, s_svd, vh_mat = jnp.linalg.svd(a, full_matrices=True)
    vt = vh_mat                                          # == V.t() in PyTorch
    s_param = jnp.ones((s_svd.shape[0],), jnp.float32)   # nn.Parameter(ones)

    # Deterministic nn.Linear(hidden, out) parameters.
    bound = 1.0 / (hidden_size ** 0.5)
    w_out = jax.random.uniform(k_w, (output_size, hidden_size),
                               minval=-bound, maxval=bound, dtype=jnp.float32)
    b_out = jax.random.uniform(k_b, (output_size,),
                               minval=-bound, maxval=bound, dtype=jnp.float32)

    # Input: (batch, input_size, M) with M == hidden_size (required by module).
    x = jax.random.normal(k_x, (batch, input_size, hidden_size),
                          dtype=jnp.float32)

    params = prepare_params(vt, s_param, u_mat, w_out, b_out)  # one-time
    out = two_layer_net(params, x)
    out = jax.block_until_ready(out)

    ref = reference(x, vt, s_param, u_mat, w_out, b_out)
    assert out.shape == (batch, hidden_size, output_size)
    assert jnp.allclose(out, ref, atol=1e-5, rtol=1e-5)

    print("KERNEL_OK")
</pallas_src>

<mosaic_0001>
module attributes {stable_mosaic.version = 11 : i64} {
  func.func @two_layer_kernel(%arg0: i32, %arg1: memref<32x16xf32, #tpu.memory_space<vmem>>, %arg2: memref<32x8xf32, #tpu.memory_space<vmem>>, %arg3: memref<1x8xf32, #tpu.memory_space<vmem>>, %arg4: memref<1x16x32xf32, #tpu.memory_space<vmem>>, %arg5: memref<1x32x8xf32, #tpu.memory_space<vmem>>) attributes {dimension_semantics = [#tpu.dimension_semantics<parallel>], iteration_bounds = array<i64: 4>, scalar_prefetch = 0 : i64, scratch_operands = 0 : i64, tpu.core_type = #tpu.core_type<tc>, window_params = [{pipeline_mode = #tpu.pipeline_mode<synchronous>, transform_indices = @transform_0, window_bounds = array<i64: 32, 16>}, {pipeline_mode = #tpu.pipeline_mode<synchronous>, transform_indices = @transform_1, window_bounds = array<i64: 32, 8>}, {pipeline_mode = #tpu.pipeline_mode<synchronous>, transform_indices = @transform_2, window_bounds = array<i64: 1, 8>}, {transform_indices = @transform_3, window_bounds = array<i64: 1, 16, 32>}, {transform_indices = @transform_4, window_bounds = array<i64: 1, 32, 8>}]} {
    %c0 = arith.constant 0 : index
    %c0_0 = arith.constant 0 : index
    %0 = vector.load %arg1[%c0, %c0_0] : memref<32x16xf32, #tpu.memory_space<vmem>>, vector<32x16xf32>
    %c0_1 = arith.constant 0 : index
    %c0_2 = arith.constant 0 : index
    %c0_3 = arith.constant 0 : index
    %1 = vector.load %arg4[%c0_1, %c0_2, %c0_3] : memref<1x16x32xf32, #tpu.memory_space<vmem>>, vector<1x16x32xf32>
    %2 = vector.shape_cast %1 : vector<1x16x32xf32> to vector<16x32xf32>
    %cst = arith.constant dense<0.000000e+00> : vector<32x32xf32>
    %3 = tpu.matmul %0, %2, %cst {dimension_numbers = #tpu.dot_dimension_numbers<[1], [0], [0], [1], [0, 0, 1, 1], [], []>} : vector<32x16xf32>, vector<16x32xf32>, vector<32x32xf32> -> vector<32x32xf32>
    %4 = arith.negf %3 : vector<32x32xf32>
    %5 = math.exp %4 : vector<32x32xf32>
    %cst_4 = arith.constant 1.000000e+00 : f32
    %6 = vector.broadcast %cst_4 : f32 to vector<32x32xf32>
    %7 = arith.addf %6, %5 : vector<32x32xf32>
    %8 = arith.divf %6, %7 : vector<32x32xf32>
    %c0_5 = arith.constant 0 : index
    %c0_6 = arith.constant 0 : index
    %9 = vector.load %arg2[%c0_5, %c0_6] : memref<32x8xf32, #tpu.memory_space<vmem>>, vector<32x8xf32>
    %cst_7 = arith.constant dense<0.000000e+00> : vector<32x8xf32>
    %10 = tpu.matmul %8, %9, %cst_7 {dimension_numbers = #tpu.dot_dimension_numbers<[1], [0], [0], [1], [0, 0, 1, 1], [], []>} : vector<32x32xf32>, vector<32x8xf32>, vector<32x8xf32> -> vector<32x8xf32>
    %c0_8 = arith.constant 0 : index
    %c0_9 = arith.constant 0 : index
    %11 = vector.load %arg3[%c0_8, %c0_9] : memref<1x8xf32, #tpu.memory_space<vmem>>, vector<1x8xf32>
    %12 = vector.broadcast %11 : vector<1x8xf32> to vector<32x8xf32>
    %13 = arith.addf %10, %12 : vector<32x8xf32>
    %c0_10 = arith.constant 0 : index
    %c0_11 = arith.constant 0 : index
    %c0_12 = arith.constant 0 : index
    %14 = vector.load %arg5[%c0_10, %c0_11, %c0_12] : memref<1x32x8xf32, #tpu.memory_space<vmem>>, vector<1x32x8xf32>
    %15 = vector.shape_cast %14 : vector<1x32x8xf32> to vector<32x8xf32>
    %16 = vector.shape_cast %13 : vector<32x8xf32> to vector<1x32x8xf32>
    tpu.vector_store %arg5[%c0_10, %c0_11, %c0_12], %16 {strides = array<i32>} : memref<1x32x8xf32, #tpu.memory_space<vmem>>, vector<1x32x8xf32>,
    return
  }
  func.func @transform_0(%arg0: i32) -> (i32, i32) {
    %c0_i32 = arith.constant 0 : i32
    %c0_i32_0 = arith.constant 0 : i32
    %c0_i32_1 = arith.constant 0 : i32
    return %c0_i32, %c0_i32_0 : i32, i32
  }
  func.func @transform_1(%arg0: i32) -> (i32, i32) {
    %c0_i32 = arith.constant 0 : i32
    %c0_i32_0 = arith.constant 0 : i32
    %c0_i32_1 = arith.constant 0 : i32
    return %c0_i32, %c0_i32_0 : i32, i32
  }
  func.func @transform_2(%arg0: i32) -> (i32, i32) {
    %c0_i32 = arith.constant 0 : i32
    %c0_i32_0 = arith.constant 0 : i32
    %c0_i32_1 = arith.constant 0 : i32
    return %c0_i32, %c0_i32_0 : i32, i32
  }
  func.func @transform_3(%arg0: i32) -> (i32, i32, i32) {
    %c0_i32 = arith.constant 0 : i32
    %c0_i32_0 = arith.constant 0 : i32
    %c0_i32_1 = arith.constant 0 : i32
    return %arg0, %c0_i32, %c0_i32_0 : i32, i32, i32
  }
  func.func @transform_4(%arg0: i32) -> (i32, i32, i32) {
    %c0_i32 = arith.constant 0 : i32
    %c0_i32_0 = arith.constant 0 : i32
    %c0_i32_1 = arith.constant 0 : i32
    return %arg0, %c0_i32, %c0_i32_0 : i32, i32, i32
  }
}

</mosaic_0001>

<bundles_post_ra>
// kernel: tpu_custom_call.1
= control target key start
LH: loop header
LB: loop body
LE: loop exit
PB: predicated region body
PF: predicated region fallthrough
CT: control target
= control target key end

     0   :  { %s616_s15 = smov 0   ;;  %s668_s0 = inlined_call_operand.vmem [shape: f32[32,16], index: 0, kind: input, shape index: {}]   ;;  %s669_s1 = inlined_call_operand.vmem [shape: f32[32,8], index: 1, kind: input, shape index: {}]   ;;  %s670_s2 = inlined_call_operand.vmem [shape: f32[1,8], index: 2, kind: input, shape index: {}]   ;;  %s671_s3 = inlined_call_operand.vmem [shape: f32[4,16,32], index: 3, kind: input, shape index: {}]   ;;  %s672_s4 = inlined_call_operand.vmem [shape: f32[4,32,8], index: 4, kind: output, shape index: {}]  }
   0x1 LB: > { %s495_s16 = sadd.s32 4294967295, %s589_s15   ;;  %p499_p0 = scmp.ge.s32.totalorder %s589_s15, 1  ;;  %s589_s15 = sphi %s616_s15, %s14_s15  }
   0x2   : > { %p162_p1 = scmp.lt.s32.totalorder %s589_s15, 5 }
   0x4   : > { %p163_p2 = pnand %p499_p0, %p162_p1 }
   0x5   : > { %p188_p3 = scmp.lt.s32.totalorder (!%p163_p2), %s495_s16, 3 }
   0x6   : > { %166 = sbr.rel (%p163_p2) target bundleno = 449 (0x1c1), region = 36 }
   0xb   : > { %v198_v0 = vld [vmem:[%s668_s0] sm:$0xff]  ;;  %vm204_vm0 = vcmask 130048   ;;  %s674_s16 = smov (!%p188_p3, %s495_s16), 3  ;;  %v199_v3 = vld [vmem:[%s668_s0 + $0x8] sm:$0xff]  ;;  %v200_v4 = vld [vmem:[%s668_s0 + $0x10] sm:$0xff]  ;;  %vm337_vm1 = vcmask 261120  }
   0xc   : > { %539 = vmatprep.mubr.msk.f32.mxu0 %vm204_vm0, %v198_v0  ;;  %s519_s19 = sshll.u32 %s674_s16, 4  ;;  %v201_v5 = vld [vmem:[%s668_s0 + $0x18] sm:$0xff]  ;;  %v328_v7 = vld [vmem:[%s669_s1 + $0x10] sm:$0xff]  ;;  %v327_v8 = vld [vmem:[%s669_s1 + $0x8] sm:$0xff]  ;;  %s520_s11 = sshll.u32 %s674_s16, 5  ;;  %vm435_vm2 = vcmask 64512  }
   0xd   : > { %s192_s22 = scalar_lea.vmem %s671_s3, %s519_s19  ;;  %v329_v6 = vld [vmem:[%s669_s1 + $0x18] sm:$0xff]  ;;  %v326_v9 = vld [vmem:[%s669_s1] sm:$0xff]  ;;  %s197_s18 = scalar_lea.vmem %s672_s4, %s520_s11 }
   0xe   : > { %v203_v1 = vld [vmem:[%s192_s22 + $0x8] sm:$0xff]  ;;  %v202_v2 = vld [vmem:[%s192_s22] sm:$0xff]  ;;  %545 = vmatprep.subr.mxu1 %v329_v6 }
   0xf   : > { %535 = vmatprep.subr.mxu0 %v203_v1  ;;  %546 = vmatpush3.msra.mxu1 %v329_v6  ;;  %v512_v30 = vld [vmem:[%s670_s2] ss:$0 sm:$0xff] }
  0x10   : > { %536 = vmatpush3.msra.mxu0 %v203_v1  ;;  %547 = vmatprep.subr.mxu1 %v328_v7 }
  0x11   : > { %537 = vmatprep.subr.mxu0 %v202_v2  ;;  %548 = vmatpush3.msra.mxu1 %v328_v7 }
  0x12   : > { %538 = vmatpush3.msra.mxu0 %v202_v2  ;;  %549 = vmatprep.subr.mxu1 %v327_v8 }
  0x13   : > { %540 = vmatmul.mubr.msk.f32.vlgmr.msra.gmra.mxu0 %vm204_vm0, %v199_v3  ;;  %550 = vmatpush3.msra.mxu1 %v327_v8 }
  0x14   : > { %542 = vmatprep.mubr.msk.f32.mxu0 %vm204_vm0, %v200_v4  ;;  %551 = vmatprep.subr.mxu1 %v326_v9 }
  0x15   : > { %552 = vmatpush3.msra.mxu1 %v326_v9 }
  0x17   : > { %543 = vmatmul.mubr.msk.f32.gmra.mxu0 %vm204_vm0, %v201_v5 }
  0xd3   : > { %v541_v10 = vpop.f32.mrf.mxu0 }
  0xd4   : > { %v509_v11 = vmul.f32 -1.442695, %v541_v10 }
  0xd5   : > { %v283_v12 = vpop.f32.mrf.mxu0 }
  0xd6   : > { %567 = vpow2.f32 %v509_v11  ;;  %v508_v13 = vmul.f32 -1.442695, %v283_v12 }
  0xd7   : > { %v544_v14 = vpop.f32.mrf.mxu0 }
  0xd8   : > { %569 = vpow2.f32 %v508_v13  ;;  %v511_v15 = vmul.f32 -1.442695, %v544_v14 }
  0xd9   : > { %v293_v16 = vpop.f32.mrf.mxu0 }
  0xda   : > { %571 = vpow2.f32 %v511_v15  ;;  %v510_v17 = vmul.f32 -1.442695, %v293_v16 }
  0xdc   : > { %573 = vpow2.f32 %v510_v17 }
  0xe3   : > { %v568_v18 = vpop.eup %567 }
  0xe4   : > { %v315_v20 = vadd.f32 1.0, %v568_v18 }
  0xe5   : > { %v570_v19 = vpop.eup %569 }
  0xe6   : > { %v314_v21 = vadd.f32 1.0, %v570_v19 }
  0xe7   : > { %v572_v22 = vpop.eup %571 }
  0xe8   : > { %575 = vrcp.f32 %v314_v21  ;;  %v317_v24 = vadd.f32 1.0, %v572_v22 }
  0xe9   : > { %v574_v23 = vpop.eup %573  ;;  %577 = vrcp.f32 %v315_v20 }
  0xea   : > { %v316_v25 = vadd.f32 1.0, %v574_v23 }
  0xec   : > { %579 = vrcp.f32 %v316_v25 }
  0xed   : > { %581 = vrcp.f32 %v317_v24 }
  0xf5   : > { %v576_v26 = vpop.eup %575 }
  0xf6   : > { %v578_v27 = vpop.eup %577  ;;  %553 = vmatprep.mubr.msk.f32.mxu1 %vm337_vm1, %v576_v26 }
  0xf7   : > { %554 = vmatmul.mubr.msk.f32.vlgmr.msra.gmra.mxu1 %vm337_vm1, %v578_v27 }
  0xf9   : > { %v580_v28 = vpop.eup %579 }
  0xfa   : > { %v582_v29 = vpop.eup %581  ;;  %556 = vmatprep.mubr.msk.f32.mxu1 %vm337_vm1, %v580_v28 }
  0xfb   : > { %557 = vmatmul.mubr.msk.f32.gmra.mxu1 %vm337_vm1, %v582_v29 }
 0x1b7   : > { %v555_v31 = vpop.f32.mrf.mxu1 }
 0x1b8   : > { %v422_v32 = vadd.f32 %v555_v31, %v512_v30 }
 0x1b9   : > { %v416_v33 = vpop.f32.mrf.mxu1 }
 0x1ba   : > { %437 = vst.msk [vmem:[%s197_s18 + $0x8] sm:$0xff] %vm435_vm2, %v422_v32  ;;  %v417_v34 = vadd.f32 %v512_v30, %v416_v33 }
 0x1bb   : > { %v558_v35 = vpop.f32.mrf.mxu1 }
 0x1bc   : > { %436 = vst.msk [vmem:[%s197_s18] sm:$0xff] %vm435_vm2, %v417_v34  ;;  %v432_v36 = vadd.f32 %v558_v35, %v512_v30 }
 0x1bd   : > { %v426_v37 = vpop.f32.mrf.mxu1 }
 0x1be   : > { %439 = vst.msk [vmem:[%s197_s18 + $0x18] sm:$0xff] %vm435_vm2, %v432_v36  ;;  %v427_v38 = vadd.f32 %v512_v30, %v426_v37 }
 0x1c0   : > { %438 = vst.msk [vmem:[%s197_s18 + $0x10] sm:$0xff] %vm435_vm2, %v427_v38 }
 0x1c1 PF: > { %s14_s15 = sadd.s32 1, %s589_s15  }
 0x1c2   : > { %p11_p4 = scmp.ge.s32.totalorder %s14_s15, 6  }
 0x1c4   :  { %13 = sbr.rel (!%p11_p4) target bundleno = 1 (0x1), region = 66 }

</bundles_post_ra>
